<compile_context>
chip_gen: v5e
topology: v5e:2x2
jax: 0.10.0
libtpu: 0.0.40
codegen_flags: <defaults>
</compile_context>

<pallas_src>
import functools

import jax
import jax.numpy as jnp
from jax.experimental import pallas as pl
from jax.experimental.pallas import tpu as pltpu

H1, H2, OUT = 256, 128, 80
OUT_PAD = 128   # lane-dense padded output width (>= OUT, multiple of 128)
SUBLANE = 8     # f32 sublane granularity for the M tile


def _round_up(x, m):
    return (x + m - 1) // m * m


def _cdiv(a, b):
    return -(-a // b)


def _pick_block_m(batch, block_m):
    """Choose an M tile: big (MXU/roofline-friendly), balanced across grid steps
    (small zero-pad tail), and >= 2 parallel steps when possible (v7x megacore)."""
    cap = min(block_m, _round_up(batch, SUBLANE))
    n_steps = _cdiv(batch, cap)
    # v7x has 2 TensorCores; give the parallel grid axis at least 2 steps when the
    # batch is big enough for each core to get >= one sublane group of rows.
    if batch >= 2 * SUBLANE:
        n_steps = max(n_steps, 2)
    # Balance rows across steps so the padded tail is at most SUBLANE*n_steps rows.
    return _round_up(_cdiv(batch, n_steps), SUBLANE)


def _mlp_kernel(x_ref, w1_ref, b1_ref, w2_ref, b2_ref, w3_ref, b3_ref, o_ref):
    # Compute (MXU input) dtype follows the weights: f32 for strict parity,
    # bf16 when use_bf16=True. Accumulation and the epilogue stay f32.
    cdt = w1_ref.dtype
    # Layer 1: Linear(D, 256) + ReLU
    h1 = jnp.dot(x_ref[...].astype(cdt), w1_ref[...],
                 preferred_element_type=jnp.float32)
    h1 = jnp.maximum(h1 + b1_ref[...], 0.0)
    # Dropout(0.3) -> identity at inference
    # Layer 2: Linear(256, 128) + ReLU
    h2 = jnp.dot(h1.astype(cdt), w2_ref[...],
                 preferred_element_type=jnp.float32)
    h2 = jnp.maximum(h2 + b2_ref[...], 0.0)
    # Dropout(0.3) -> identity at inference
    # Layer 3: Linear(128, 128-padded) -- lane-dense store, sliced to 80 outside.
    o = jnp.dot(h2.astype(cdt), w3_ref[...],
                preferred_element_type=jnp.float32)
    o_ref[...] = (o + b3_ref[...]).astype(o_ref.dtype)


@functools.partial(jax.jit, static_argnames=("block_m", "use_bf16"))
def mlp_forward(x, w1, b1, w2, b2, w3, b3, *, block_m=1024, use_bf16=False):
    """Fused 3-layer MLP forward. x: (B, D) float32 -> (B, 80) float32."""
    B, D = x.shape

    bm = _pick_block_m(B, block_m)
    B_pad = _round_up(B, bm)
    grid = (B_pad // bm,)

    # Pad only the batch (to a tile multiple); padded rows are discarded by the
    # final [:B] slice. No feature-dim padding of x (K=D is legal as a full-extent
    # block dim and an MXU pass with small K costs no more than K padded to 128).
    x_p = x if B_pad == B else jnp.pad(x, ((0, B_pad - B), (0, 0)))

    # Zero-pad the last layer to 128 output lanes (numerically inert: padded lanes
    # come from zero w3 columns / b3 entries and are sliced off).
    w3_p = jnp.pad(w3, ((0, 0), (0, OUT_PAD - OUT)))
    b3_p = jnp.pad(b3, ((0, 0), (0, OUT_PAD - OUT)))

    # Optional bf16 MXU operands (weights stored bf16 -> half the weight DMA too).
    w_dtype = jnp.bfloat16 if use_bf16 else jnp.float32
    w1c = w1.astype(w_dtype)
    w2c = w2.astype(w_dtype)
    w3c = w3_p.astype(w_dtype)
    w_bytes = 2 if use_bf16 else 4

    # Grid-invariant operands: constant (0, 0) index map + single buffer
    # (double-buffering a block whose index never changes is wasted VMEM).
    def invariant(shape):
        return pl.BlockSpec(shape, lambda i: (0, 0),
                            pipeline_mode=pl.Buffered(buffer_count=1))

    in_specs = [
        pl.BlockSpec((bm, D), lambda i: (i, 0)),  # x tile (double-buffered stream)
        invariant((D, H1)),                        # w1
        invariant((1, H1)),                        # b1
        invariant((H1, H2)),                       # w2
        invariant((1, H2)),                        # b2
        invariant((H2, OUT_PAD)),                  # w3 (padded to 128 lanes)
        invariant((1, OUT_PAD)),                   # b3 (padded to 128 lanes)
    ]
    out_spec = pl.BlockSpec((bm, OUT_PAD), lambda i: (i, 0))

    # Explicit VMEM budget with headroom below v7x's 64 MiB per-core VMEM.
    vmem_est = (
        2 * bm * D * 4                                   # x tile, double-buffered
        + 2 * bm * OUT_PAD * 4                           # out tile, double-buffered
        + (D * H1 + H1 * H2 + H2 * OUT_PAD) * w_bytes    # weights, single-buffered
        + (H1 + H2 + OUT_PAD) * 4                        # biases
        + 2 * bm * H1 * 4                                # live f32 intermediates
    )
    vmem_limit = int(min(48 * 1024 * 1024, max(16 * 1024 * 1024, 2 * vmem_est)))

    out_padded = pl.pallas_call(
        _mlp_kernel,
        out_shape=jax.ShapeDtypeStruct((B_pad, OUT_PAD), jnp.float32),
        grid_spec=pltpu.PrefetchScalarGridSpec(
            num_scalar_prefetch=0,
            grid=grid,
            in_specs=in_specs,
            out_specs=out_spec,
        ),
        compiler_params=pltpu.CompilerParams(
            dimension_semantics=("parallel",),
            vmem_limit_bytes=vmem_limit,
        ),
    )(x_p, w1c, b1, w2c, b2, w3c, b3_p)

    # NOTE: consumers that can take the lane-padded (B_pad, 128) output directly
    # (or fuse this slice into the next op) save one HBM round trip.
    return out_padded[:B, :OUT]


def init_params(key, input_dim):
    """Deterministic init mimicking PyTorch nn.Linear (uniform +/- 1/sqrt(fan_in))."""
    ks = jax.random.split(key, 6)

    def linear(kw, kb, fan_in, fan_out):
        bound = 1.0 / jnp.sqrt(fan_in)
        w = jax.random.uniform(kw, (fan_in, fan_out), jnp.float32, -bound, bound)
        b = jax.random.uniform(kb, (1, fan_out), jnp.float32, -bound, bound)
        return w, b

    w1, b1 = linear(ks[0], ks[1], input_dim, H1)
    w2, b2 = linear(ks[2], ks[3], H1, H2)
    w3, b3 = linear(ks[4], ks[5], H2, OUT)
    return w1, b1, w2, b2, w3, b3


def _ref_forward(x, w1, b1, w2, b2, w3, b3):
    h1 = jnp.maximum(x @ w1 + b1, 0.0)
    h2 = jnp.maximum(h1 @ w2 + b2, 0.0)
    return h2 @ w3 + b3


if __name__ == "__main__":
    key = jax.random.PRNGKey(0)
    k_x, k_p = jax.random.split(key)

    batch, input_dim = 8, 32
    x = jax.random.normal(k_x, (batch, input_dim), jnp.float32)
    w1, b1, w2, b2, w3, b3 = init_params(k_p, input_dim)

    # f32 path (strict parity with the PyTorch module).
    out = jax.block_until_ready(mlp_forward(x, w1, b1, w2, b2, w3, b3))
    ref = _ref_forward(x, w1, b1, w2, b2, w3, b3)
    assert out.shape == (batch, OUT)
    assert jnp.allclose(out, ref, atol=1e-4, rtol=1e-4)

    # Non-multiple tiny batch (padded-tail path, single grid step).
    x2 = jax.random.normal(k_x, (5, input_dim), jnp.float32)
    out2 = jax.block_until_ready(mlp_forward(x2, w1, b1, w2, b2, w3, b3))
    ref2 = _ref_forward(x2, w1, b1, w2, b2, w3, b3)
    assert out2.shape == (5, OUT)
    assert jnp.allclose(out2, ref2, atol=1e-4, rtol=1e-4)

    # Mid-size batch: exercises the balanced-tile / >=2 parallel grid steps path.
    x3 = jax.random.normal(k_x, (300, input_dim), jnp.float32)
    out3 = jax.block_until_ready(mlp_forward(x3, w1, b1, w2, b2, w3, b3))
    ref3 = _ref_forward(x3, w1, b1, w2, b2, w3, b3)
    assert out3.shape == (300, OUT)
    assert jnp.allclose(out3, ref3, atol=1e-4, rtol=1e-4)

    # Optional bf16 MXU-operand path (relaxed tolerance).
    out_bf16 = jax.block_until_ready(
        mlp_forward(x3, w1, b1, w2, b2, w3, b3, use_bf16=True))
    assert out_bf16.shape == (300, OUT)
    assert jnp.allclose(out_bf16, ref3, atol=5e-2, rtol=5e-2)

    print("KERNEL_OK")
</pallas_src>

<mosaic_0001>
module attributes {stable_mosaic.version = 11 : i64} {
  func.func @_mlp_kernel(%arg0: i32, %arg1: memref<8x32xf32, #tpu.memory_space<vmem>>, %arg2: memref<32x256xf32, #tpu.memory_space<vmem>>, %arg3: memref<1x256xf32, #tpu.memory_space<vmem>>, %arg4: memref<256x128xf32, #tpu.memory_space<vmem>>, %arg5: memref<1x128xf32, #tpu.memory_space<vmem>>, %arg6: memref<128x128xf32, #tpu.memory_space<vmem>>, %arg7: memref<1x128xf32, #tpu.memory_space<vmem>>, %arg8: memref<8x128xf32, #tpu.memory_space<vmem>>) attributes {dimension_semantics = [#tpu.dimension_semantics<parallel>], iteration_bounds = array<i64: 1>, scalar_prefetch = 0 : i64, scratch_operands = 0 : i64, tpu.core_type = #tpu.core_type<tc>, window_params = [{transform_indices = @transform_0, window_bounds = array<i64: 8, 32>}, {pipeline_mode = #tpu.pipeline_mode<synchronous>, transform_indices = @transform_1, window_bounds = array<i64: 32, 256>}, {pipeline_mode = #tpu.pipeline_mode<synchronous>, transform_indices = @transform_2, window_bounds = array<i64: 1, 256>}, {pipeline_mode = #tpu.pipeline_mode<synchronous>, transform_indices = @transform_3, window_bounds = array<i64: 256, 128>}, {pipeline_mode = #tpu.pipeline_mode<synchronous>, transform_indices = @transform_4, window_bounds = array<i64: 1, 128>}, {pipeline_mode = #tpu.pipeline_mode<synchronous>, transform_indices = @transform_5, window_bounds = array<i64: 128, 128>}, {pipeline_mode = #tpu.pipeline_mode<synchronous>, transform_indices = @transform_6, window_bounds = array<i64: 1, 128>}, {transform_indices = @transform_7, window_bounds = array<i64: 8, 128>}]} {
    %c0 = arith.constant 0 : index
    %c0_0 = arith.constant 0 : index
    %0 = vector.load %arg1[%c0, %c0_0] : memref<8x32xf32, #tpu.memory_space<vmem>>, vector<8x32xf32>
    %c0_1 = arith.constant 0 : index
    %c0_2 = arith.constant 0 : index
    %1 = vector.load %arg2[%c0_1, %c0_2] : memref<32x256xf32, #tpu.memory_space<vmem>>, vector<32x256xf32>
    %cst = arith.constant dense<0.000000e+00> : vector<8x256xf32>
    %2 = tpu.matmul %0, %1, %cst {dimension_numbers = #tpu.dot_dimension_numbers<[1], [0], [0], [1], [0, 0, 1, 1], [], []>} : vector<8x32xf32>, vector<32x256xf32>, vector<8x256xf32> -> vector<8x256xf32>
    %c0_3 = arith.constant 0 : index
    %c0_4 = arith.constant 0 : index
    %3 = vector.load %arg3[%c0_3, %c0_4] : memref<1x256xf32, #tpu.memory_space<vmem>>, vector<1x256xf32>
    %4 = vector.broadcast %3 : vector<1x256xf32> to vector<8x256xf32>
    %5 = arith.addf %2, %4 : vector<8x256xf32>
    %cst_5 = arith.constant 0.000000e+00 : f32
    %6 = vector.broadcast %cst_5 : f32 to vector<8x256xf32>
    %7 = arith.maximumf %5, %6 : vector<8x256xf32>
    %c0_6 = arith.constant 0 : index
    %c0_7 = arith.constant 0 : index
    %8 = vector.load %arg4[%c0_6, %c0_7] : memref<256x128xf32, #tpu.memory_space<vmem>>, vector<256x128xf32>
    %cst_8 = arith.constant dense<0.000000e+00> : vector<8x128xf32>
    %9 = tpu.matmul %7, %8, %cst_8 {dimension_numbers = #tpu.dot_dimension_numbers<[1], [0], [0], [1], [0, 0, 1, 1], [], []>} : vector<8x256xf32>, vector<256x128xf32>, vector<8x128xf32> -> vector<8x128xf32>
    %c0_9 = arith.constant 0 : index
    %c0_10 = arith.constant 0 : index
    %10 = vector.load %arg5[%c0_9, %c0_10] : memref<1x128xf32, #tpu.memory_space<vmem>>, vector<1x128xf32>
    %11 = vector.broadcast %10 : vector<1x128xf32> to vector<8x128xf32>
    %12 = arith.addf %9, %11 : vector<8x128xf32>
    %cst_11 = arith.constant 0.000000e+00 : f32
    %13 = vector.broadcast %cst_11 : f32 to vector<8x128xf32>
    %14 = arith.maximumf %12, %13 : vector<8x128xf32>
    %c0_12 = arith.constant 0 : index
    %c0_13 = arith.constant 0 : index
    %15 = vector.load %arg6[%c0_12, %c0_13] : memref<128x128xf32, #tpu.memory_space<vmem>>, vector<128x128xf32>
    %cst_14 = arith.constant dense<0.000000e+00> : vector<8x128xf32>
    %16 = tpu.matmul %14, %15, %cst_14 {dimension_numbers = #tpu.dot_dimension_numbers<[1], [0], [0], [1], [0, 0, 1, 1], [], []>} : vector<8x128xf32>, vector<128x128xf32>, vector<8x128xf32> -> vector<8x128xf32>
    %c0_15 = arith.constant 0 : index
    %c0_16 = arith.constant 0 : index
    %17 = vector.load %arg7[%c0_15, %c0_16] : memref<1x128xf32, #tpu.memory_space<vmem>>, vector<1x128xf32>
    %18 = vector.broadcast %17 : vector<1x128xf32> to vector<8x128xf32>
    %19 = arith.addf %16, %18 : vector<8x128xf32>
    %c0_17 = arith.constant 0 : index
    %c0_18 = arith.constant 0 : index
    %20 = vector.load %arg8[%c0_17, %c0_18] : memref<8x128xf32, #tpu.memory_space<vmem>>, vector<8x128xf32>
    tpu.vector_store %arg8[%c0_17, %c0_18], %19 {strides = array<i32>} : memref<8x128xf32, #tpu.memory_space<vmem>>, vector<8x128xf32>,
    return
  }
  func.func @transform_0(%arg0: i32) -> (i32, i32) {
    %c0_i32 = arith.constant 0 : i32
    %c0_i32_0 = arith.constant 0 : i32
    return %arg0, %c0_i32 : i32, i32
  }
  func.func @transform_1(%arg0: i32) -> (i32, i32) {
    %c0_i32 = arith.constant 0 : i32
    %c0_i32_0 = arith.constant 0 : i32
    %c0_i32_1 = arith.constant 0 : i32
    return %c0_i32, %c0_i32_0 : i32, i32
  }
  func.func @transform_2(%arg0: i32) -> (i32, i32) {
    %c0_i32 = arith.constant 0 : i32
    %c0_i32_0 = arith.constant 0 : i32
    %c0_i32_1 = arith.constant 0 : i32
    return %c0_i32, %c0_i32_0 : i32, i32
  }
  func.func @transform_3(%arg0: i32) -> (i32, i32) {
    %c0_i32 = arith.constant 0 : i32
    %c0_i32_0 = arith.constant 0 : i32
    %c0_i32_1 = arith.constant 0 : i32
    return %c0_i32, %c0_i32_0 : i32, i32
  }
  func.func @transform_4(%arg0: i32) -> (i32, i32) {
    %c0_i32 = arith.constant 0 : i32
    %c0_i32_0 = arith.constant 0 : i32
    %c0_i32_1 = arith.constant 0 : i32
    return %c0_i32, %c0_i32_0 : i32, i32
  }
  func.func @transform_5(%arg0: i32) -> (i32, i32) {
    %c0_i32 = arith.constant 0 : i32
    %c0_i32_0 = arith.constant 0 : i32
    %c0_i32_1 = arith.constant 0 : i32
    return %c0_i32, %c0_i32_0 : i32, i32
  }
  func.func @transform_6(%arg0: i32) -> (i32, i32) {
    %c0_i32 = arith.constant 0 : i32
    %c0_i32_0 = arith.constant 0 : i32
    %c0_i32_1 = arith.constant 0 : i32
    return %c0_i32, %c0_i32_0 : i32, i32
  }
  func.func @transform_7(%arg0: i32) -> (i32, i32) {
    %c0_i32 = arith.constant 0 : i32
    %c0_i32_0 = arith.constant 0 : i32
    return %arg0, %c0_i32 : i32, i32
  }
}

</mosaic_0001>

<bundles_post_ra>
// kernel: mlp_forward.1
= control target key start
LH: loop header
LB: loop body
LE: loop exit
PB: predicated region body
PF: predicated region fallthrough
CT: control target
= control target key end

     0   :  { %vm42_vm0 = vcmask 261120   ;;  %s479_s0 = inlined_call_operand.vmem [shape: f32[8,32], index: 0, kind: input, shape index: {}]   ;;  %s480_s1 = inlined_call_operand.vmem [shape: f32[32,256], index: 1, kind: input, shape index: {}]   ;;  %s481_s2 = inlined_call_operand.vmem [shape: f32[1,256], index: 2, kind: input, shape index: {}]   ;;  %s482_s3 = inlined_call_operand.vmem [shape: f32[256,128], index: 3, kind: input, shape index: {}]   ;;  %s483_s4 = inlined_call_operand.vmem [shape: f32[1,128], index: 4, kind: input, shape index: {}]   ;;  %s484_s5 = inlined_call_operand.vmem [shape: f32[128,128], index: 5, kind: input, shape index: {}]   ;;  %s485_s6 = inlined_call_operand.vmem [shape: f32[1,128], index: 6, kind: input, shape index: {}]   ;;  %s486_s7 = inlined_call_operand.hbm [shape: f32[8,128], index: 7, kind: output, shape index: {}]  }
   0x1   :  { %v34_v0 = vld [vmem:[%s480_s1 + $0x30] sm:$0xff]  ;;  %v32_v1 = vld [vmem:[%s480_s1 + $0x20] sm:$0xff]  ;;  %v103_v3 = vld [vmem:[%s482_s3 + $0x78] sm:$0xff] }
   0x2   :  { %58 = vmatpush.msra.mxu1 %v34_v0  ;;  %v30_v2 = vld [vmem:[%s480_s1 + $0x10] sm:$0xff]  ;;  %v28_v5 = vld [vmem:[%s480_s1] sm:$0xff]  ;;  %124 = vmatpush.msra.mxu2 %v103_v3  ;;  %v119_v6 = vld [vmem:[%s482_s3 + $0xf8] sm:$0xff] }
   0x3   :  { %v102_v4 = vld [vmem:[%s482_s3 + $0x70] sm:$0xff]  ;;  %v27_v7 = vld [vmem:[%s479_s0] sm:$0xff]  ;;  %v101_v8 = vld [vmem:[%s482_s3 + $0x68] sm:$0xff]  ;;  %144 = vmatpush.msra.mxu3 %v119_v6 }
   0x4   :  { %59 = vmatpush.msra.mxu1 %v32_v1  ;;  %v118_v9 = vld [vmem:[%s482_s3 + $0xf0] sm:$0xff]  ;;  %v35_v10 = vld [vmem:[%s480_s1 + $0x38] sm:$0xff]  ;;  %125 = vmatpush.msra.mxu2 %v102_v4  ;;  %v117_v11 = vld [vmem:[%s482_s3 + $0xe8] sm:$0xff] }
   0x5   :  { %v100_v12 = vld [vmem:[%s482_s3 + $0x60] sm:$0xff]  ;;  %145 = vmatpush.msra.mxu3 %v118_v9  ;;  %v33_v13 = vld [vmem:[%s480_s1 + $0x28] sm:$0xff]  ;;  %v99_v15 = vld [vmem:[%s482_s3 + $0x58] sm:$0xff] }
   0x6   :  { %60 = vmatpush.msra.mxu1 %v30_v2  ;;  %126 = vmatpush.msra.mxu2 %v101_v8  ;;  %v116_v14 = vld [vmem:[%s482_s3 + $0xe0] sm:$0xff]  ;;  %v31_v16 = vld [vmem:[%s480_s1 + $0x18] sm:$0xff]  ;;  %v98_v18 = vld [vmem:[%s482_s3 + $0x50] sm:$0xff] }
   0x7   :  { %146 = vmatpush.msra.mxu3 %v117_v11  ;;  %v115_v17 = vld [vmem:[%s482_s3 + $0xd8] sm:$0xff] }
   0x8   :  { %61 = vmatpush.msra.mxu1 %v28_v5  ;;  %127 = vmatpush.msra.mxu2 %v100_v12 }
   0x9   :  { %222 = vmatmul.msk.f32.vlgmr.msra.gmra.mxu1 %vm42_vm0, %v27_v7  ;;  %147 = vmatpush.msra.mxu3 %v116_v14 }
   0xa   :  { %78 = vmatpush.msrb.mxu1 %v35_v10 }
   0xc   :  { %79 = vmatpush.msrb.mxu1 %v33_v13 }
   0xd   :  { %12 = vsyncpa [#allocation3], 0  ;;  %v29_v19 = vld [vmem:[%s480_s1 + $0x8] sm:$0xff]  ;;  %128 = vmatpush.msra.mxu2 %v99_v15  ;;  %v114_v20 = vld [vmem:[%s482_s3 + $0xd0] sm:$0xff]  ;;  %148 = vmatpush.msra.mxu3 %v115_v17  ;;  %s253_s19 = smov [#allocation2]  }
   0xe   :  { %80 = vmatpush.msrb.mxu1 %v31_v16  ;;  %v97_v21 = vld [vmem:[%s482_s3 + $0x48] sm:$0xff]  ;;  %v96_v23 = vld [vmem:[%s482_s3 + $0x40] sm:$0xff]  ;;  %v95_v25 = vld [vmem:[%s482_s3 + $0x38] sm:$0xff]  ;;  %s211_s20 = sshll.u32 %s253_s19, 4  ;;  %s212_s20 = int_to_ptr.vmem [resolvable:$true] %s211_s20 }
   0xf   :  { %129 = vmatpush.msra.mxu2 %v98_v18  ;;  %v113_v22 = vld [vmem:[%s482_s3 + $0xc8] sm:$0xff]  ;;  %149 = vmatpush.msra.mxu3 %v114_v20  ;;  %v112_v24 = vld [vmem:[%s482_s3 + $0xc0] sm:$0xff]  ;;  %v111_v26 = vld [vmem:[%s482_s3 + $0xb8] sm:$0xff] }
  0x10   :  { %81 = vmatpush.msrb.mxu1 %v29_v19  ;;  %v94_v27 = vld [vmem:[%s482_s3 + $0x30] sm:$0xff]  ;;  %v93_v28 = vld [vmem:[%s482_s3 + $0x28] sm:$0xff]  ;;  %v92_v29 = vld [vmem:[%s482_s3 + $0x20] sm:$0xff] }
  0x11   :  { %223 = vmatmul.msk.f32.vlgmr.msrb.gmra.mxu1 %vm42_vm0, %v27_v7  ;;  %130 = vmatpush.msra.mxu2 %v97_v21  ;;  %v91_v30 = vld [vmem:[%s482_s3 + $0x18] sm:$0xff]  ;;  %v90_v31 = vld [vmem:[%s482_s3 + $0x10] sm:$0xff]  ;;  %v89_v33 = vld [vmem:[%s482_s3 + $0x8] sm:$0xff] }
  0x12   :  { %150 = vmatpush.msra.mxu3 %v113_v22  ;;  %v110_v32 = vld [vmem:[%s482_s3 + $0xb0] sm:$0xff]  ;;  %v109_v34 = vld [vmem:[%s482_s3 + $0xa8] sm:$0xff]  ;;  %v88_v35 = vld [vmem:[%s482_s3] sm:$0xff] }
  0x13   :  { %131 = vmatpush.msra.mxu2 %v96_v23  ;;  %v108_v36 = vld [vmem:[%s482_s3 + $0xa0] sm:$0xff]  ;;  %v107_v37 = vld [vmem:[%s482_s3 + $0x98] sm:$0xff]  ;;  %v106_v38 = vld [vmem:[%s482_s3 + $0x90] sm:$0xff] }
  0x14   :  { %151 = vmatpush.msra.mxu3 %v112_v24  ;;  %v105_v39 = vld [vmem:[%s482_s3 + $0x88] sm:$0xff]  ;;  %v104_v40 = vld [vmem:[%s482_s3 + $0x80] sm:$0xff]  ;;  %v180_v41 = vld [vmem:[%s484_s5 + $0x78] sm:$0xff] }
  0x15   :  { %132 = vmatpush.msra.mxu2 %v95_v25  ;;  %v179_v42 = vld [vmem:[%s484_s5 + $0x70] sm:$0xff]  ;;  %185 = vmatpush.msra.mxu0 %v180_v41  ;;  %v178_v43 = vld [vmem:[%s484_s5 + $0x68] sm:$0xff]  ;;  %v177_v44 = vld [vmem:[%s484_s5 + $0x60] sm:$0xff] }
  0x16   :  { %152 = vmatpush.msra.mxu3 %v111_v26  ;;  %v176_v45 = vld [vmem:[%s484_s5 + $0x58] sm:$0xff]  ;;  %v175_v46 = vld [vmem:[%s484_s5 + $0x50] sm:$0xff]  ;;  %v174_v47 = vld [vmem:[%s484_s5 + $0x48] sm:$0xff] }
  0x17   :  { %133 = vmatpush.msra.mxu2 %v94_v27  ;;  %186 = vmatpush.msra.mxu0 %v179_v42  ;;  %v173_v48 = vld [vmem:[%s484_s5 + $0x40] sm:$0xff]  ;;  %v172_v50 = vld [vmem:[%s484_s5 + $0x38] sm:$0xff]  ;;  %v171_v59 = vld [vmem:[%s484_s5 + $0x30] sm:$0xff] }
  0x18   :  { %153 = vmatpush.msra.mxu3 %v110_v32  ;;  %v36_v49 = vld [vmem:[%s481_s2] sm:$0x3]  ;;  %v170_v60 = vld [vmem:[%s484_s5 + $0x28] sm:$0xff]  ;;  %v168_v62 = vld [vmem:[%s484_s5 + $0x18] sm:$0xff] }
  0x19   :  { %134 = vmatpush.msra.mxu2 %v93_v28  ;;  %187 = vmatpush.msra.mxu0 %v178_v43  ;;  %v38_v51 = vperm.slane %v36_v49, 0  ;;  %v39_v55 = vperm.slane %v36_v49, 1  ;;  %v169_v61 = vld [vmem:[%s484_s5 + $0x20] sm:$0xff]  ;;  %v167_v63 = vld [vmem:[%s484_s5 + $0x10] sm:$0xff]  ;;  %v166_v0 = vld [vmem:[%s484_s5 + $0x8] sm:$0xff] }
  0x1a   :  { %154 = vmatpush.msra.mxu3 %v109_v34  ;;  %v165_v1 = vld [vmem:[%s484_s5] sm:$0xff]  ;;  %s213_s5 = sshll.u32 %s486_s7, 4  ;;  %s214_s5 = int_to_ptr.hbm [resolvable:$true] %s213_s5 }
  0x1b   :  { %135 = vmatpush.msra.mxu2 %v92_v29  ;;  %188 = vmatpush.msra.mxu0 %v177_v44  ;;  %v225_v2 = vld [vmem:[%s483_s4] ss:$0 sm:$0xff] }
  0x1c   :  { %155 = vmatpush.msra.mxu3 %v108_v36  ;;  %v226_v8 = vld [vmem:[%s485_s6] ss:$0 sm:$0xff] }
  0x1d   :  { %136 = vmatpush.msra.mxu2 %v91_v30  ;;  %189 = vmatpush.msra.mxu0 %v176_v45 }
  0x1e   :  { %156 = vmatpush.msra.mxu3 %v107_v37 }
  0x1f   :  { %137 = vmatpush.msra.mxu2 %v90_v31  ;;  %190 = vmatpush.msra.mxu0 %v175_v46 }
  0x20   :  { %157 = vmatpush.msra.mxu3 %v106_v38 }
  0x21   :  { %138 = vmatpush.msra.mxu2 %v89_v33  ;;  %191 = vmatpush.msra.mxu0 %v174_v47 }
  0x22   :  { %158 = vmatpush.msra.mxu3 %v105_v39 }
  0x23   :  { %139 = vmatpush.msra.mxu2 %v88_v35  ;;  %192 = vmatpush.msra.mxu0 %v173_v48 }
  0x24   :  { %159 = vmatpush.msra.mxu3 %v104_v40 }
  0x25   :  { %193 = vmatpush.msra.mxu0 %v172_v50 }
  0x27   :  { %194 = vmatpush.msra.mxu0 %v171_v59 }
  0x29   :  { %195 = vmatpush.msra.mxu0 %v170_v60 }
  0x2b   :  { %196 = vmatpush.msra.mxu0 %v169_v61 }
  0x2d   :  { %197 = vmatpush.msra.mxu0 %v168_v62 }
  0x2f   :  { %198 = vmatpush.msra.mxu0 %v167_v63 }
  0x31   :  { %199 = vmatpush.msra.mxu0 %v166_v0 }
  0x33   :  { %200 = vmatpush.msra.mxu0 %v165_v1 }
  0x86   :  { %v63_v52 = vpop.f32.mrf.mxu1 }
  0x87   :  { %v64_v53 = vadd.f32 %v63_v52, %v38_v51 }
  0x89   :  { %v86_v54 = vmax.f32 %v64_v53, 0.0 }
  0x8b   :  { %140 = vmatmul.f32.vlgmr.msra.gmra.mxu2 %v86_v54 }
  0x8e   :  { %v83_v56 = vpop.f32.mrf.mxu1 }
  0x8f   :  { %v84_v57 = vadd.f32 %v83_v56, %v39_v55 }
  0x91   :  { %v87_v58 = vmax.f32 %v84_v57, 0.0 }
  0x93   :  { %160 = vmatmul.f32.vlgmr.msra.gmra.mxu3 %v87_v58 }
 0x10e   :  { %v141_v3 = vpop.f32.mrf.mxu2 }
 0x10f   :  { %v142_v4 = vadd.f32 %v225_v2, %v141_v3 }
 0x116   :  { %v161_v5 = vpop.f32.mrf.mxu3 }
 0x117   :  { %v162_v6 = vadd.f32 %v161_v5, %v142_v4 }
 0x119   :  { %v164_v7 = vmax.f32 %v162_v6, 0.0 }
 0x11b   :  { %201 = vmatmul.f32.vlgmr.msra.gmra.mxu0 %v164_v7 }
 0x198   :  { %v202_v9 = vpop.f32.mrf.mxu0 }
 0x199   :  { %v203_v10 = vadd.f32 %v226_v8, %v202_v9 }
 0x19b   :  { %205 = vst [vmem:[#allocation2] sm:$0xff] %v203_v10 }
 0x19c   :  { %216 = dma.vmem_to_hbm [thread:$0]  %s212_s20, 128, %s214_s5, [#allocation3]  }
 0x19d   :  { %251 = dma.done.wait [#allocation3], 128  }
 0x19e   :  { %252 = vsyncadd [#allocation3], 4294967168 }
 0x19f   :  { %221 = vsyncpa [#allocation3], 1 }

</bundles_post_ra>
